<compile_context>
chip_gen: v7x
topology: tpu7x:2x2x1
jax: 0.10.0
libtpu: 0.0.40
codegen_flags: <defaults>
</compile_context>

<pallas_src>
import functools

import jax
import jax.numpy as jnp
from jax.experimental import pallas as pl
from jax.experimental.pallas import tpu as pltpu

_LANE = 128
_MIB = 1024 * 1024


def _round_up(v, m):
    return ((v + m - 1) // m) * m


def final_layer_kernel(x_ref, c_ref,
                       w_shift_ref, b_shift_ref,
                       w_scale_ref, b_scale1_ref,
                       w_lin_ref, b_lin_ref,
                       o_ref):
    # (TN, D) row tile; feature dim maps to lanes. LN / elementwise in f32.
    x = x_ref[...].astype(jnp.float32)
    c = c_ref[...].astype(jnp.float32)

    # adaLN modulation: SiLU -> two D->D matmuls on pre-split bf16 weights.
    silu_c = c * jax.nn.sigmoid(c)
    silu_mx = silu_c.astype(w_shift_ref.dtype)
    shift = jnp.dot(silu_mx, w_shift_ref[...],
                    preferred_element_type=jnp.float32) + b_shift_ref[...]
    # b_scale1 already contains the modulate "+1" (folded in the wrapper).
    scale1 = jnp.dot(silu_mx, w_scale_ref[...],
                     preferred_element_type=jnp.float32) + b_scale1_ref[...]

    # LayerNorm over last dim, eps=1e-6, no elementwise affine (f32 stats).
    mean = jnp.mean(x, axis=-1, keepdims=True)
    xc = x - mean
    var = jnp.mean(xc * xc, axis=-1, keepdims=True)
    normed = xc * jax.lax.rsqrt(var + 1e-6)

    # modulate: normed * (1 + scale) + shift  ==  normed * scale1 + shift
    y = normed * scale1 + shift

    # final linear D -> A_pad (lane-dense, zero-padded columns).
    out = jnp.dot(y.astype(w_lin_ref.dtype), w_lin_ref[...],
                  preferred_element_type=jnp.float32) + b_lin_ref[...]
    o_ref[...] = out.astype(o_ref.dtype)


def _resident_spec(shape):
    """Constant-index_map BlockSpec; single-buffered (nothing to prefetch)."""
    idx = lambda i: (0,) * len(shape)
    try:
        return pl.BlockSpec(shape, idx, pipeline_mode=pl.Buffered(1))
    except (AttributeError, TypeError):  # older jax without pipeline_mode
        return pl.BlockSpec(shape, idx)


@functools.partial(jax.jit,
                   static_argnames=("row_tile", "weight_dtype", "input_dtype"))
def final_layer(x, c, w_ada, b_ada, w_lin, b_lin, *,
                row_tile=1024, weight_dtype=jnp.bfloat16, input_dtype=None):
    """x, c: (B, S, D); w_ada: (D, 2D); b_ada: (2D,); w_lin: (D, A); b_lin: (A,)."""
    B, S, D = x.shape
    A = w_lin.shape[1]
    N = B * S

    # --- wrapper-side layout / dtype prep (free) -----------------------------
    # Pre-split adaLN weights (bf16 MXU operands); f32 biases; fold the "+1".
    w_shift = w_ada[:, :D].astype(weight_dtype)
    w_scale = w_ada[:, D:].astype(weight_dtype)
    b_shift = b_ada[:D].astype(jnp.float32).reshape(1, D)
    b_scale1 = (b_ada[D:].astype(jnp.float32) + 1.0).reshape(1, D)

    # Lane-dense output: pad the action dim up to a multiple of 128.
    A_pad = max(_LANE, _round_up(A, _LANE))
    w_lin_p = jnp.zeros((D, A_pad), dtype=weight_dtype).at[:, :A].set(
        w_lin.astype(weight_dtype))
    b_lin_p = jnp.zeros((1, A_pad), dtype=jnp.float32).at[0, :A].set(
        b_lin.astype(jnp.float32))

    x2 = x.reshape(N, D)
    c2 = c.reshape(N, D)
    if input_dtype is not None:   # optional: halve x/c HBM traffic (small-D regime)
        x2 = x2.astype(input_dtype)
        c2 = c2.astype(input_dtype)

    in_itemsize = jnp.dtype(x2.dtype).itemsize
    out_itemsize = jnp.dtype(x.dtype).itemsize
    w_itemsize = jnp.dtype(weight_dtype).itemsize

    # --- row tile + VMEM limit derived from actual buffer sizes --------------
    # Resident (single-buffered) weights + f32 biases:
    weight_bytes = D * (2 * D + A_pad) * w_itemsize + (2 * D + A_pad) * 4
    # Per-row VMEM: double-buffered x/c, double-buffered out, ~8 f32 (row, D)
    # intermediates (silu/shift/scale/xc/normed/y + narrow copies).
    per_row = 4 * D * in_itemsize + 2 * A_pad * out_itemsize + 8 * D * 4

    budget = 40 * _MIB   # safe under v7x's 64 MiB physical VMEM
    N_r8 = _round_up(N, 8)
    if N_r8 <= row_tile:
        # Small problems: ensure >= 2 grid steps so the row axis can shard
        # across both TensorCores on v7x.
        TN = _round_up((N_r8 + 1) // 2, 8) if N_r8 >= 16 else N_r8
    else:
        row_cap = max(256, (row_tile // 256) * 256)       # MXU-friendly tiles
        avail = max(budget - weight_bytes, 0)
        TN = max(256, min(row_cap, (avail // per_row) // 256 * 256))

    N_pad = _round_up(N, TN)
    if N_pad != N:
        x2 = jnp.pad(x2, ((0, N_pad - N), (0, 0)))
        c2 = jnp.pad(c2, ((0, N_pad - N), (0, 0)))
    grid = (N_pad // TN,)

    vmem_need = weight_bytes + TN * per_row
    vmem_limit = int(min(max(vmem_need + 16 * _MIB, 32 * _MIB), 96 * _MIB))

    cost = pl.CostEstimate(
        flops=2 * N_pad * D * (2 * D + A_pad) + 10 * N_pad * D,
        transcendentals=N_pad * D,                           # sigmoid
        bytes_accessed=(2 * N_pad * D * in_itemsize
                        + N_pad * A_pad * out_itemsize
                        + (D * (2 * D + A_pad)) * w_itemsize
                        + (2 * D + A_pad) * 4),
    )

    out = pl.pallas_call(
        final_layer_kernel,
        out_shape=jax.ShapeDtypeStruct((N_pad, A_pad), x.dtype),
        grid_spec=pltpu.PrefetchScalarGridSpec(
            num_scalar_prefetch=0,
            grid=grid,
            in_specs=[
                pl.BlockSpec((TN, D), lambda i: (i, 0)),   # x (tiled rows)
                pl.BlockSpec((TN, D), lambda i: (i, 0)),   # c (tiled rows)
                _resident_spec((D, D)),                    # w_shift (resident)
                _resident_spec((1, D)),                    # b_shift
                _resident_spec((D, D)),                    # w_scale (resident)
                _resident_spec((1, D)),                    # b_scale (+1 folded)
                _resident_spec((D, A_pad)),                # w_lin (padded)
                _resident_spec((1, A_pad)),                # b_lin (padded)
            ],
            out_specs=pl.BlockSpec((TN, A_pad), lambda i: (i, 0)),
        ),
        compiler_params=pltpu.CompilerParams(
            dimension_semantics=("parallel",),
            vmem_limit_bytes=vmem_limit,
        ),
        cost_estimate=cost,
    )(x2, c2, w_shift, b_shift, w_scale, b_scale1, w_lin_p, b_lin_p)

    return out[:N, :A].reshape(B, S, A)


def reference(x, c, w_ada, b_ada, w_lin, b_lin, mm_dtype=jnp.float32):
    """Pure-JAX reference; mm_dtype lets us precision-match the bf16 MXU path."""
    silu_c = c * jax.nn.sigmoid(c)
    mod = jnp.dot(silu_c.astype(mm_dtype), w_ada.astype(mm_dtype),
                  preferred_element_type=jnp.float32) + b_ada
    D = x.shape[-1]
    shift, scale = mod[..., :D], mod[..., D:]
    mean = jnp.mean(x, axis=-1, keepdims=True)
    var = jnp.mean((x - mean) ** 2, axis=-1, keepdims=True)
    normed = (x - mean) * jax.lax.rsqrt(var + 1e-6)
    y = normed * (1.0 + scale) + shift
    out = jnp.dot(y.astype(mm_dtype), w_lin.astype(mm_dtype),
                  preferred_element_type=jnp.float32) + b_lin
    return out.astype(x.dtype)


if __name__ == "__main__":
    B, S, model_dim, action_dim = 2, 8, 32, 4

    key = jax.random.PRNGKey(0)
    kx, kc, kwa, kwl = jax.random.split(key, 4)

    x = jax.random.normal(kx, (B, S, model_dim), dtype=jnp.float32)
    c = jax.random.normal(kc, (B, S, model_dim), dtype=jnp.float32)

    # Deterministic synthetic params (orthogonal init replaced by scaled
    # normal; biases zero as in the PyTorch module's wt_init_).
    w_ada = jax.random.normal(kwa, (model_dim, 2 * model_dim),
                              dtype=jnp.float32) * (1.0 / jnp.sqrt(model_dim))
    b_ada = jnp.zeros((2 * model_dim,), dtype=jnp.float32)
    w_lin = jax.random.normal(kwl, (model_dim, action_dim),
                              dtype=jnp.float32) * (1.0 / jnp.sqrt(model_dim))
    b_lin = jnp.zeros((action_dim,), dtype=jnp.float32)

    out = final_layer(x, c, w_ada, b_ada, w_lin, b_lin)
    out = jax.block_until_ready(out)
    assert out.shape == (B, S, action_dim)

    # Precision-matched check (bf16 MXU operands, f32 accumulation) ...
    ref_bf16 = reference(x, c, w_ada, b_ada, w_lin, b_lin, mm_dtype=jnp.bfloat16)
    assert jnp.allclose(out, ref_bf16, atol=5e-3, rtol=5e-3), \
        float(jnp.max(jnp.abs(out - ref_bf16)))
    # ... and a semantics sanity check against the full-f32 reference.
    ref_f32 = reference(x, c, w_ada, b_ada, w_lin, b_lin, mm_dtype=jnp.float32)
    assert jnp.allclose(out, ref_f32, atol=5e-2, rtol=5e-2), \
        float(jnp.max(jnp.abs(out - ref_f32)))

    print("KERNEL_OK")
</pallas_src>

<mosaic_0001>
module attributes {stable_mosaic.version = 11 : i64} {
  func.func @final_layer_kernel(%arg0: i32, %arg1: memref<8x32xf32, #tpu.memory_space<vmem>>, %arg2: memref<8x32xf32, #tpu.memory_space<vmem>>, %arg3: memref<32x32xbf16, #tpu.memory_space<vmem>>, %arg4: memref<1x32xf32, #tpu.memory_space<vmem>>, %arg5: memref<32x32xbf16, #tpu.memory_space<vmem>>, %arg6: memref<1x32xf32, #tpu.memory_space<vmem>>, %arg7: memref<32x128xbf16, #tpu.memory_space<vmem>>, %arg8: memref<1x128xf32, #tpu.memory_space<vmem>>, %arg9: memref<8x128xf32, #tpu.memory_space<vmem>>) attributes {dimension_semantics = [#tpu.dimension_semantics<parallel>], iteration_bounds = array<i64: 2>, scalar_prefetch = 0 : i64, scratch_operands = 0 : i64, tpu.core_type = #tpu.core_type<tc>, window_params = [{transform_indices = @transform_0, window_bounds = array<i64: 8, 32>}, {transform_indices = @transform_1, window_bounds = array<i64: 8, 32>}, {pipeline_mode = #tpu.pipeline_mode<synchronous>, transform_indices = @transform_2, window_bounds = array<i64: 32, 32>}, {pipeline_mode = #tpu.pipeline_mode<synchronous>, transform_indices = @transform_3, window_bounds = array<i64: 1, 32>}, {pipeline_mode = #tpu.pipeline_mode<synchronous>, transform_indices = @transform_4, window_bounds = array<i64: 32, 32>}, {pipeline_mode = #tpu.pipeline_mode<synchronous>, transform_indices = @transform_5, window_bounds = array<i64: 1, 32>}, {pipeline_mode = #tpu.pipeline_mode<synchronous>, transform_indices = @transform_6, window_bounds = array<i64: 32, 128>}, {pipeline_mode = #tpu.pipeline_mode<synchronous>, transform_indices = @transform_7, window_bounds = array<i64: 1, 128>}, {transform_indices = @transform_8, window_bounds = array<i64: 8, 128>}]} {
    %c0 = arith.constant 0 : index
    %c0_0 = arith.constant 0 : index
    %0 = vector.load %arg1[%c0, %c0_0] : memref<8x32xf32, #tpu.memory_space<vmem>>, vector<8x32xf32>
    %c0_1 = arith.constant 0 : index
    %c0_2 = arith.constant 0 : index
    %1 = vector.load %arg2[%c0_1, %c0_2] : memref<8x32xf32, #tpu.memory_space<vmem>>, vector<8x32xf32>
    %2 = arith.negf %1 : vector<8x32xf32>
    %3 = math.exp %2 : vector<8x32xf32>
    %cst = arith.constant 1.000000e+00 : f32
    %4 = vector.broadcast %cst : f32 to vector<8x32xf32>
    %5 = arith.addf %4, %3 : vector<8x32xf32>
    %6 = arith.divf %4, %5 : vector<8x32xf32>
    %7 = arith.mulf %1, %6 : vector<8x32xf32>
    %8 = arith.truncf %7 : vector<8x32xf32> to vector<8x32xbf16>
    %c0_3 = arith.constant 0 : index
    %c0_4 = arith.constant 0 : index
    %9 = vector.load %arg3[%c0_3, %c0_4] : memref<32x32xbf16, #tpu.memory_space<vmem>>, vector<32x32xbf16>
    %cst_5 = arith.constant dense<0.000000e+00> : vector<8x32xf32>
    %10 = tpu.matmul %8, %9, %cst_5 {dimension_numbers = #tpu.dot_dimension_numbers<[1], [0], [0], [1], [0, 0, 1, 1], [], []>} : vector<8x32xbf16>, vector<32x32xbf16>, vector<8x32xf32> -> vector<8x32xf32>
    %c0_6 = arith.constant 0 : index
    %c0_7 = arith.constant 0 : index
    %11 = vector.load %arg4[%c0_6, %c0_7] : memref<1x32xf32, #tpu.memory_space<vmem>>, vector<1x32xf32>
    %12 = vector.broadcast %11 : vector<1x32xf32> to vector<8x32xf32>
    %13 = arith.addf %10, %12 : vector<8x32xf32>
    %c0_8 = arith.constant 0 : index
    %c0_9 = arith.constant 0 : index
    %14 = vector.load %arg5[%c0_8, %c0_9] : memref<32x32xbf16, #tpu.memory_space<vmem>>, vector<32x32xbf16>
    %cst_10 = arith.constant dense<0.000000e+00> : vector<8x32xf32>
    %15 = tpu.matmul %8, %14, %cst_10 {dimension_numbers = #tpu.dot_dimension_numbers<[1], [0], [0], [1], [0, 0, 1, 1], [], []>} : vector<8x32xbf16>, vector<32x32xbf16>, vector<8x32xf32> -> vector<8x32xf32>
    %c0_11 = arith.constant 0 : index
    %c0_12 = arith.constant 0 : index
    %16 = vector.load %arg6[%c0_11, %c0_12] : memref<1x32xf32, #tpu.memory_space<vmem>>, vector<1x32xf32>
    %17 = vector.broadcast %16 : vector<1x32xf32> to vector<8x32xf32>
    %18 = arith.addf %15, %17 : vector<8x32xf32>
    %cst_13 = arith.constant dense<0.000000e+00> : vector<8xf32>
    %19 = vector.multi_reduction <add>, %0, %cst_13 [1] : vector<8x32xf32> to vector<8xf32>
    %20 = vector.shape_cast %19 : vector<8xf32> to vector<8x1xf32>
    %cst_14 = arith.constant 3.200000e+01 : f32
    %21 = vector.broadcast %cst_14 : f32 to vector<8x1xf32>
    %22 = arith.divf %20, %21 : vector<8x1xf32>
    %23 = vector.broadcast %22 : vector<8x1xf32> to vector<8x32xf32>
    %24 = arith.subf %0, %23 : vector<8x32xf32>
    %25 = arith.mulf %24, %24 : vector<8x32xf32>
    %cst_15 = arith.constant dense<0.000000e+00> : vector<8xf32>
    %26 = vector.multi_reduction <add>, %25, %cst_15 [1] : vector<8x32xf32> to vector<8xf32>
    %27 = vector.shape_cast %26 : vector<8xf32> to vector<8x1xf32>
    %cst_16 = arith.constant 3.200000e+01 : f32
    %28 = vector.broadcast %cst_16 : f32 to vector<8x1xf32>
    %29 = arith.divf %27, %28 : vector<8x1xf32>
    %cst_17 = arith.constant 9.99999997E-7 : f32
    %30 = vector.broadcast %cst_17 : f32 to vector<8x1xf32>
    %31 = arith.addf %29, %30 : vector<8x1xf32>
    %32 = math.rsqrt %31 : vector<8x1xf32>
    %33 = vector.broadcast %32 : vector<8x1xf32> to vector<8x32xf32>
    %34 = arith.mulf %24, %33 : vector<8x32xf32>
    %35 = arith.mulf %34, %18 : vector<8x32xf32>
    %36 = arith.addf %35, %13 : vector<8x32xf32>
    %37 = arith.truncf %36 : vector<8x32xf32> to vector<8x32xbf16>
    %c0_18 = arith.constant 0 : index
    %c0_19 = arith.constant 0 : index
    %38 = vector.load %arg7[%c0_18, %c0_19] : memref<32x128xbf16, #tpu.memory_space<vmem>>, vector<32x128xbf16>
    %cst_20 = arith.constant dense<0.000000e+00> : vector<8x128xf32>
    %39 = tpu.matmul %37, %38, %cst_20 {dimension_numbers = #tpu.dot_dimension_numbers<[1], [0], [0], [1], [0, 0, 1, 1], [], []>} : vector<8x32xbf16>, vector<32x128xbf16>, vector<8x128xf32> -> vector<8x128xf32>
    %c0_21 = arith.constant 0 : index
    %c0_22 = arith.constant 0 : index
    %40 = vector.load %arg8[%c0_21, %c0_22] : memref<1x128xf32, #tpu.memory_space<vmem>>, vector<1x128xf32>
    %41 = vector.broadcast %40 : vector<1x128xf32> to vector<8x128xf32>
    %42 = arith.addf %39, %41 : vector<8x128xf32>
    %c0_23 = arith.constant 0 : index
    %c0_24 = arith.constant 0 : index
    %43 = vector.load %arg9[%c0_23, %c0_24] : memref<8x128xf32, #tpu.memory_space<vmem>>, vector<8x128xf32>
    tpu.vector_store %arg9[%c0_23, %c0_24], %42 {strides = array<i32>} : memref<8x128xf32, #tpu.memory_space<vmem>>, vector<8x128xf32>,
    return
  }
  func.func @transform_0(%arg0: i32) -> (i32, i32) {
    %c0_i32 = arith.constant 0 : i32
    %c0_i32_0 = arith.constant 0 : i32
    return %arg0, %c0_i32 : i32, i32
  }
  func.func @transform_1(%arg0: i32) -> (i32, i32) {
    %c0_i32 = arith.constant 0 : i32
    %c0_i32_0 = arith.constant 0 : i32
    return %arg0, %c0_i32 : i32, i32
  }
  func.func @transform_2(%arg0: i32) -> (i32, i32) {
    %c0_i32 = arith.constant 0 : i32
    %c0_i32_0 = arith.constant 0 : i32
    %c0_i32_1 = arith.constant 0 : i32
    return %c0_i32, %c0_i32_0 : i32, i32
  }
  func.func @transform_3(%arg0: i32) -> (i32, i32) {
    %c0_i32 = arith.constant 0 : i32
    %c0_i32_0 = arith.constant 0 : i32
    %c0_i32_1 = arith.constant 0 : i32
    return %c0_i32, %c0_i32_0 : i32, i32
  }
  func.func @transform_4(%arg0: i32) -> (i32, i32) {
    %c0_i32 = arith.constant 0 : i32
    %c0_i32_0 = arith.constant 0 : i32
    %c0_i32_1 = arith.constant 0 : i32
    return %c0_i32, %c0_i32_0 : i32, i32
  }
  func.func @transform_5(%arg0: i32) -> (i32, i32) {
    %c0_i32 = arith.constant 0 : i32
    %c0_i32_0 = arith.constant 0 : i32
    %c0_i32_1 = arith.constant 0 : i32
    return %c0_i32, %c0_i32_0 : i32, i32
  }
  func.func @transform_6(%arg0: i32) -> (i32, i32) {
    %c0_i32 = arith.constant 0 : i32
    %c0_i32_0 = arith.constant 0 : i32
    %c0_i32_1 = arith.constant 0 : i32
    return %c0_i32, %c0_i32_0 : i32, i32
  }
  func.func @transform_7(%arg0: i32) -> (i32, i32) {
    %c0_i32 = arith.constant 0 : i32
    %c0_i32_0 = arith.constant 0 : i32
    %c0_i32_1 = arith.constant 0 : i32
    return %c0_i32, %c0_i32_0 : i32, i32
  }
  func.func @transform_8(%arg0: i32) -> (i32, i32) {
    %c0_i32 = arith.constant 0 : i32
    %c0_i32_0 = arith.constant 0 : i32
    return %arg0, %c0_i32 : i32, i32
  }
}

</mosaic_0001>

<bundles_post_ra>
// kernel: final_layer.1
= control target key start
LH: loop header
LB: loop body
LE: loop exit
PB: predicated region body
PF: predicated region fallthrough
CT: control target
= control target key end

     0   :  { %s741_s27 = smov 0   ;;  %s801_s0 = inlined_call_operand.vmem [shape: f32[16,32], index: 0, kind: input, shape index: {}]   ;;  %s802_s1 = inlined_call_operand.vmem [shape: f32[16,32], index: 1, kind: input, shape index: {}]   ;;  %s803_s2 = inlined_call_operand.vmem [shape: bf16[32,32], index: 2, kind: input, shape index: {}]   ;;  %s804_s3 = inlined_call_operand.vmem [shape: f32[1,32], index: 3, kind: input, shape index: {}]   ;;  %s805_s4 = inlined_call_operand.vmem [shape: bf16[32,32], index: 4, kind: input, shape index: {}]   ;;  %s806_s5 = inlined_call_operand.vmem [shape: f32[1,32], index: 5, kind: input, shape index: {}]   ;;  %s807_s6 = inlined_call_operand.vmem [shape: bf16[32,128], index: 6, kind: input, shape index: {}]   ;;  %s808_s7 = inlined_call_operand.vmem [shape: f32[1,128], index: 7, kind: input, shape index: {}]   ;;  %s809_s8 = inlined_call_operand.vmem [shape: f32[16,128], index: 8, kind: output, shape index: {}]  }
   0x1 LB: > { %s608_s28 = sadd.s32 4294967295, %s692_s27   ;;  %p612_p0 = scmp.ge.s32.totalorder %s692_s27, 1  ;;  %s692_s27 = sphi %s741_s27, %s18_s27  }
   0x2   : > { %p270_p1 = scmp.lt.s32.totalorder %s692_s27, 3 }
   0x4   : > { %p271_p2 = pnand %p612_p0, %p270_p1 }
   0x5   : > { %p306_p3 = scmp.lt.s32.totalorder (!%p271_p2), %s608_s28, 1  ;;  %vm352_vm0 = vcmask (!%p271_p2), 261120   ;;  %v674_v0 = vld [vmem:[%s805_s4] sm:$0xff] (!%p271_p2)   ;;  %v694_v1 = vmov (!%p271_p2), 0.0   ;;  %v676_v3 = vld [vmem:[%s805_s4 + $0x8] sm:$0xff] (!%p271_p2)   ;;  %vm695_vm1 = vmmov (!%p271_p2), 0  }
   0x6   : > { %274 = sbr.rel (%p271_p2) target bundleno = 547 (0x223), region = 52  ;;  %648 = vmatprep.subr.bf16.mxu1 (!%p271_p2), %v694_v1  ;;  %640 = vmatprep.subr.bf16.mxu0 (!%p271_p2), %v694_v1  ;;  %v675_v2 = vld [vmem:[%s803_s2] sm:$0xff] (!%p271_p2)   ;;  %v677_v4 = vld [vmem:[%s803_s2 + $0x8] sm:$0xff] (!%p271_p2)  }
   0x7   : > { %649 = vmatpush3.bf16.msra.mxu1 (!%p271_p2), %v674_v0  ;;  %641 = vmatpush3.bf16.msra.mxu0 (!%p271_p2), %v675_v2  ;;  %v678_v19 = vld [vmem:[%s807_s6] sm:$0xff] (!%p271_p2)   ;;  %v679_v20 = vld [vmem:[%s807_s6 + $0x8] sm:$0xff] (!%p271_p2)  }
   0x8   : > { %650 = vmatprep.subr.bf16.mxu1 (!%p271_p2), %v694_v1  ;;  %652 = vmatprep.mubr.msk.bf16.mxu1 (!%p271_p2), %vm695_vm1, %v694_v1  ;;  %v621_v32 = vld [vmem:[%s806_s5] ss:$0 sm:$0xff] (!%p271_p2) }
   0x9   : > { %642 = vmatprep.subr.bf16.mxu0 (!%p271_p2), %v694_v1  ;;  %644 = vmatprep.mubr.msk.bf16.mxu0 (!%p271_p2), %vm695_vm1, %v694_v1  ;;  %v617_v33 = vld [vmem:[%s804_s3] ss:$0 sm:$0xff] (!%p271_p2) }
   0xa   : > { %v625_v41 = vld [vmem:[%s808_s7] ss:$0 sm:$0xff] (!%p271_p2) }
   0xb   : > { %651 = vmatpush3.bf16.msra.mxu1 (!%p271_p2), %v676_v3  ;;  %643 = vmatpush3.bf16.msra.mxu0 (!%p271_p2), %v677_v4 }
   0xc   : > { %656 = vmatprep.subr.bf16.mxu0 (!%p271_p2), %v694_v1 }
   0xd   : > { %s811_s28 = smov (!%p306_p3, %s608_s28), 1 }
   0xe   : > { %s758_s13 = sshll.u32 %s811_s28, 3 }
   0xf   : > { %s309_s18 = scalar_lea.vmem %s801_s0, %s758_s13  ;;  %s313_s21 = scalar_lea.vmem %s802_s1, %s758_s13 }
  0x10   : > { %v319_v5 = vld [vmem:[%s309_s18] sm:$0xff]  ;;  %s317_s14 = scalar_lea.vmem %s809_s8, %s758_s13 }
  0x11   : > { %v320_v6 = vld [vmem:[%s313_s21] sm:$0xff]  ;;  %v459_v8 = vsel %vm352_vm0, %v319_v5, 0.0 }
  0x12   : > { %v616_v7 = vmul.f32 -1.442695, %v320_v6  ;;  %460 = vadd.xlane.f32.xlu0 %v459_v8 }
  0x14   : > { %680 = vpow2.f32 %v616_v7 }
  0x1e   : > { %v681_v9 = vpop.eup %680 }
  0x1f   : > { %v324_v10 = vadd.f32 1.0, %v681_v9 }
  0x21   : > { %682 = vrcp.f32 %v324_v10 }
  0x2b   : > { %v683_v11 = vpop.eup %682 }
  0x2c   : > { %v327_v12 = vmul.f32 %v683_v11, %v320_v6 }
  0x2e   : > { %v328_v13 = vpack.c.bf16 %v327_v12, %v327_v12 }
  0x30   : > { %653 = vmatmul.mubr.msk.bf16.vlgmr.msra.gmra.mrb[0].mxu1 %vm352_vm0, %v328_v13  ;;  %645 = vmatmul.mubr.msk.bf16.vlgmr.msra.gmra.mrb[0].mxu0 %vm352_vm0, %v328_v13 }
  0x31   : > { %660 = vmatprep.mubr.msk.bf16.mxu0 %vm695_vm1, %v694_v1  ;;  %657 = vmatpush3.bf16.msra.mxu0 %v678_v19 }
  0x32   : > { %658 = vmatprep.subr.bf16.mxu0 %v694_v1 }
  0x35   : > { %659 = vmatpush3.bf16.msra.mxu0 %v679_v20 }
  0x9f   : > { %v461_v14 = vpop.xlane.xlu0 %460 }
  0xa0   : > { %v463_v15 = vmul.f32 0.03125, %v461_v14 }
  0xa2   : > { %v464_v16 = vsub.f32 %v319_v5, %v463_v15 }
  0xa4   : > { %v465_v17 = vmul.f32 %v464_v16, %v464_v16 }
  0xa6   : > { %v466_v18 = vsel %vm352_vm0, %v465_v17, 0.0 }
  0xa7   : > { %467 = vadd.xlane.f32.xlu0 %v466_v18 }
 0x103   : > { %v453_v21 = vpop.f32.mrb[0].mxu1  ;;  %v390_v22 = vpop.f32.mrb[0].mxu0 }
 0x104   : > { %v654_v23 = vpop.f32.mrb[1].mxu1  ;;  %v646_v24 = vpop.f32.mrb[1].mxu0  ;;  %v454_v34 = vadd.f32 %v621_v32, %v453_v21  ;;  %v391_v37 = vadd.f32 %v617_v33, %v390_v22 }
 0x105   : > { %v456_v25 = vpop.f32.mrb[2].mxu1  ;;  %v393_v26 = vpop.f32.mrb[2].mxu0 }
 0x106   : > { %v655_v27 = vpop.f32.mrb[3].mxu1  ;;  %v647_v28 = vpop.f32.mrb[3].mxu0 }
 0x134   : > { %v468_v29 = vpop.xlane.xlu0 %467 }
 0x135   : > { %v469_v30 = vmul.f32 0.03125, %v468_v29 }
 0x137   : > { %v470_v31 = vadd.f32 1e-06, %v469_v30 }
 0x139   : > { %684 = vrsqrt.f32 %v470_v31 }
 0x143   : > { %v685_v35 = vpop.eup %684 }
 0x144   : > { %v472_v36 = vmul.f32 %v685_v35, %v464_v16 }
 0x146   : > { %v473_v38 = vmul.f32 %v472_v36, %v454_v34 }
 0x148   : > { %v474_v39 = vadd.f32 %v473_v38, %v391_v37 }
 0x14a   : > { %v475_v40 = vpack.c.bf16 %v474_v39, %v474_v39 }
 0x14c   : > { %661 = vmatmul.mubr.msk.bf16.vlgmr.msra.gmra.mrb[4].mxu0 %vm352_vm0, %v475_v40 }
 0x21f   : > { %v536_v42 = vpop.f32.mrb[4].mxu0 }
 0x220   : > { %v537_v43 = vadd.f32 %v625_v41, %v536_v42  ;;  %v662_v44 = vpop.f32.mrb[5].mxu0 }
 0x221   : > { %v539_v45 = vpop.f32.mrb[6].mxu0 }
 0x222   : > { %542 = vst [vmem:[%s317_s14] sm:$0xff] %v537_v43  ;;  %v663_v46 = vpop.f32.mrb[7].mxu0 }
 0x223 PF: > { %s18_s27 = sadd.s32 1, %s692_s27  }
 0x224   : > { %p15_p4 = scmp.ge.s32.totalorder %s18_s27, 4  }
 0x226   :  { %17 = sbr.rel (!%p15_p4) target bundleno = 1 (0x1), region = 85 }

</bundles_post_ra>
